<compile_context>
chip_gen: v7x
topology: tpu7x:2x2x1
jax: 0.10.0
libtpu: 0.0.40
codegen_flags: <defaults>
</compile_context>

<pallas_src>
import math
import jax
import jax.numpy as jnp
from jax.experimental import pallas as pl
from jax.experimental.pallas import tpu as pltpu

SPEC_LEN = 500   # pseudoVoigtSimulatorTorch(500): spectrum length / encoder in_features
HIDDEN   = 128
LATENT   = 8
PACK     = 128   # lanes of packed [z | mu | logvar | 0...] small-output buffer
BATCH    = 8


# ---------------------------------------------------------------------------
# Fused kernel: encoder MLP + reparameterization + pseudo-Voigt decoder.
# ---------------------------------------------------------------------------
def vae_fused_kernel(x_ref, w1_ref, b1_ref, wml_ref, bml_ref, eps_ref, e_ref,
                     pv_ref, zml_ref):
    bm = x_ref.shape[0]

    # ---- encoder MLP (MXU) ----
    h = jnp.dot(x_ref[...], w1_ref[...],
                preferred_element_type=jnp.float32) + b1_ref[...]
    h = jnp.maximum(h, 0.0)                                    # ReLU

    # single matmul for [mu | logvar]  (merged heads)
    ml = jnp.dot(h, wml_ref[...],
                 preferred_element_type=jnp.float32) + bml_ref[...]
    mu = ml[:, :LATENT]
    logvar = ml[:, LATENT:]

    # ---- reparameterization ----
    z = mu + jnp.exp(0.5 * logvar) * eps_ref[...]              # qz.rsample()

    # ---- packed [z | mu | logvar | 0]: ONE unmasked 128-lane store ----
    pad = jnp.zeros((bm, PACK - 3 * LATENT), jnp.float32)
    zml_ref[...] = jnp.concatenate([z, ml, pad], axis=1)

    # ---- pseudo-Voigt decoder (alpha = z): one MXU matmul against the
    #      block-diagonal profile matrix E:  pv[b, l*S + s] = z[b, l] * prof[s]
    pv_ref[...] = jnp.dot(z, e_ref[...], preferred_element_type=jnp.float32)


def vae_pallas_call(x, w1, b1, wml, bml, eps, e_mat, bm):
    b = x.shape[0]
    assert b % bm == 0
    out_shapes = (
        jax.ShapeDtypeStruct((b, LATENT * SPEC_LEN), jnp.float32),  # pv (flat)
        jax.ShapeDtypeStruct((b, PACK), jnp.float32),               # [z|mu|logvar]
    )
    return pl.pallas_call(
        vae_fused_kernel,
        out_shape=out_shapes,
        grid=(b // bm,),
        in_specs=[
            pl.BlockSpec((bm, SPEC_LEN), lambda i: (i, 0)),              # x
            pl.BlockSpec((SPEC_LEN, HIDDEN), lambda i: (0, 0)),          # W1
            pl.BlockSpec((1, HIDDEN), lambda i: (0, 0)),                 # b1
            pl.BlockSpec((HIDDEN, 2 * LATENT), lambda i: (0, 0)),        # [Wmu|Wlv]
            pl.BlockSpec((1, 2 * LATENT), lambda i: (0, 0)),             # [bmu|blv]
            pl.BlockSpec((bm, LATENT), lambda i: (i, 0)),                # eps
            pl.BlockSpec((LATENT, LATENT * SPEC_LEN), lambda i: (0, 0)), # E (resident)
        ],
        out_specs=(
            pl.BlockSpec((bm, LATENT * SPEC_LEN), lambda i: (i, 0)),
            pl.BlockSpec((bm, PACK), lambda i: (i, 0)),
        ),
        compiler_params=pltpu.CompilerParams(
            dimension_semantics=("parallel",)),   # batch axis -> both TCs on v7x
    )(x, w1, b1, wml, bml, eps, e_mat)


def _pick_bm(b):
    """Block rows: full batch at b<=8; otherwise >=2 grid steps (v7x megacore),
    capped at 256 so the double-buffered pv slab fits every generation's VMEM."""
    if b <= 8:
        return b
    return max(8, min(256, ((b + 1) // 2 + 7) // 8 * 8))


# ---------------------------------------------------------------------------
# Wrapper = VAE.forward (plus z, mu, logvar from encode())
# ---------------------------------------------------------------------------
@jax.jit
def vae_forward(x, packed_params, eps):
    w1, b1, wml, bml, e_mat = packed_params
    b = x.shape[0]
    bm = _pick_bm(b)
    b_pad = ((b + bm - 1) // bm) * bm
    if b_pad != b:                            # ragged batch -> pad rows with zeros
        x = jnp.pad(x, ((0, b_pad - b), (0, 0)))
        eps = jnp.pad(eps, ((0, b_pad - b), (0, 0)))
    pv_flat, zml = vae_pallas_call(x, w1, b1, wml, bml, eps, e_mat, bm)
    # (b, LATENT*SPEC_LEN) -> (b, LATENT, SPEC_LEN): contiguous regroup (no copy)
    pv = pv_flat[:b].reshape(b, LATENT, SPEC_LEN)
    z = zml[:b, :LATENT]
    mu = zml[:b, LATENT:2 * LATENT]
    logvar = zml[:b, 2 * LATENT:3 * LATENT]
    return pv, z, mu, logvar


# ---------------------------------------------------------------------------
# Parameter construction / one-time packing
# ---------------------------------------------------------------------------
def init_params(key):
    """Deterministic PyTorch-style Linear init: U(-1/sqrt(fan_in), 1/sqrt(fan_in))."""
    ks = jax.random.split(key, 6)
    def lin(kw, kb, fan_in, fan_out):
        bound = 1.0 / math.sqrt(fan_in)
        w = jax.random.uniform(kw, (fan_in, fan_out), jnp.float32, -bound, bound)
        b = jax.random.uniform(kb, (1, fan_out), jnp.float32, -bound, bound)
        return w, b
    w1, b1   = lin(ks[0], ks[1], SPEC_LEN, HIDDEN)   # encoder1
    wmu, bmu = lin(ks[2], ks[3], HIDDEN, LATENT)     # encoder_mu
    wlv, blv = lin(ks[4], ks[5], HIDDEN, LATENT)     # encoder_logvar
    return (w1, b1, wmu, bmu, wlv, blv)


def _voigt_profile():
    # TODO(synk): pseudoVoigtSimulatorTorch source is not provided; a standard
    # height-normalized pseudo-Voigt (eta*Lorentzian + (1-eta)*Gaussian) on a
    # normalized wavenumber axis is assumed.
    wn = jnp.arange(SPEC_LEN, dtype=jnp.float32) / float(SPEC_LEN)
    c = 250.0 / 500.0                         # peaks = tensor([250/500])
    gamma = 20.0 / float(SPEC_LEN)            # gamma normalized with the axis
    eta = 0.5
    d2 = (wn - c) ** 2
    hwhm = gamma / 2.0
    lorentz = hwhm * hwhm / (d2 + hwhm * hwhm)              # height 1 at center
    sig_g = gamma / (2.0 * math.sqrt(2.0 * math.log(2.0)))
    gauss = jnp.exp(-d2 / (2.0 * sig_g * sig_g))            # height 1 at center
    return eta * lorentz + (1.0 - eta) * gauss              # (SPEC_LEN,)


def pack_params(params):
    """One-time repack: merge mu/logvar heads; build block-diagonal profile E."""
    w1, b1, wmu, bmu, wlv, blv = params
    wml = jnp.concatenate([wmu, wlv], axis=1)                # (HIDDEN, 2*LATENT)
    bml = jnp.concatenate([bmu, blv], axis=1)                # (1, 2*LATENT)
    prof = _voigt_profile()
    e_mat = jnp.kron(jnp.eye(LATENT, dtype=jnp.float32),
                     prof.reshape(1, -1))                    # (LATENT, LATENT*SPEC_LEN)
    return (w1, b1, wml, bml, e_mat)


if __name__ == "__main__":
    key = jax.random.PRNGKey(0)
    k_x, k_eps, k_p = jax.random.split(key, 3)
    x = jax.random.normal(k_x, (BATCH, SPEC_LEN), jnp.float32)
    eps = jax.random.normal(k_eps, (BATCH, LATENT), jnp.float32)
    params = init_params(k_p)
    packed = pack_params(params)

    pv, z, mu, logvar = vae_forward(x, packed, eps)
    jax.block_until_ready((pv, z, mu, logvar))

    # ---- plain-JAX reference smoke check ----
    w1, b1, wmu, bmu, wlv, blv = params
    h_r = jnp.maximum(x @ w1 + b1, 0.0)
    mu_r = h_r @ wmu + bmu
    lv_r = h_r @ wlv + blv
    z_r = mu_r + jnp.exp(0.5 * lv_r) * eps
    prof_r = _voigt_profile()
    pv_r = z_r[:, :, None] * prof_r[None, None, :]

    assert pv.shape == (BATCH, LATENT, SPEC_LEN)
    assert z.shape == (BATCH, LATENT)
    assert jnp.allclose(mu, mu_r, atol=1e-2, rtol=1e-2), "mu mismatch"
    assert jnp.allclose(logvar, lv_r, atol=1e-2, rtol=1e-2), "logvar mismatch"
    assert jnp.allclose(z, z_r, atol=1e-2, rtol=1e-2), "z mismatch"
    assert jnp.allclose(pv, pv_r, atol=1e-2, rtol=1e-2), "pv mismatch"
    print("KERNEL_OK")
</pallas_src>

<mosaic_0001>
module attributes {stable_mosaic.version = 11 : i64} {
  func.func @vae_fused_kernel(%arg0: i32, %arg1: memref<8x500xf32, #tpu.memory_space<vmem>>, %arg2: memref<500x128xf32, #tpu.memory_space<vmem>>, %arg3: memref<1x128xf32, #tpu.memory_space<vmem>>, %arg4: memref<128x16xf32, #tpu.memory_space<vmem>>, %arg5: memref<1x16xf32, #tpu.memory_space<vmem>>, %arg6: memref<8x8xf32, #tpu.memory_space<vmem>>, %arg7: memref<8x4000xf32, #tpu.memory_space<vmem>>, %arg8: memref<8x4000xf32, #tpu.memory_space<vmem>>, %arg9: memref<8x128xf32, #tpu.memory_space<vmem>>) attributes {dimension_semantics = [#tpu.dimension_semantics<parallel>], iteration_bounds = array<i64: 1>, scalar_prefetch = 0 : i64, scratch_operands = 0 : i64, tpu.core_type = #tpu.core_type<tc>, window_params = [{transform_indices = @transform_0, window_bounds = array<i64: 8, 500>}, {pipeline_mode = #tpu.pipeline_mode<synchronous>, transform_indices = @transform_1, window_bounds = array<i64: 500, 128>}, {pipeline_mode = #tpu.pipeline_mode<synchronous>, transform_indices = @transform_2, window_bounds = array<i64: 1, 128>}, {pipeline_mode = #tpu.pipeline_mode<synchronous>, transform_indices = @transform_3, window_bounds = array<i64: 128, 16>}, {pipeline_mode = #tpu.pipeline_mode<synchronous>, transform_indices = @transform_4, window_bounds = array<i64: 1, 16>}, {transform_indices = @transform_5, window_bounds = array<i64: 8, 8>}, {pipeline_mode = #tpu.pipeline_mode<synchronous>, transform_indices = @transform_6, window_bounds = array<i64: 8, 4000>}, {transform_indices = @transform_7, window_bounds = array<i64: 8, 4000>}, {transform_indices = @transform_8, window_bounds = array<i64: 8, 128>}]} {
    %c0 = arith.constant 0 : index
    %c0_0 = arith.constant 0 : index
    %0 = vector.load %arg1[%c0, %c0_0] : memref<8x500xf32, #tpu.memory_space<vmem>>, vector<8x500xf32>
    %c0_1 = arith.constant 0 : index
    %c0_2 = arith.constant 0 : index
    %1 = vector.load %arg2[%c0_1, %c0_2] : memref<500x128xf32, #tpu.memory_space<vmem>>, vector<500x128xf32>
    %cst = arith.constant dense<0.000000e+00> : vector<8x128xf32>
    %2 = tpu.matmul %0, %1, %cst {dimension_numbers = #tpu.dot_dimension_numbers<[1], [0], [0], [1], [0, 0, 1, 1], [], []>} : vector<8x500xf32>, vector<500x128xf32>, vector<8x128xf32> -> vector<8x128xf32>
    %c0_3 = arith.constant 0 : index
    %c0_4 = arith.constant 0 : index
    %3 = vector.load %arg3[%c0_3, %c0_4] : memref<1x128xf32, #tpu.memory_space<vmem>>, vector<1x128xf32>
    %4 = vector.broadcast %3 : vector<1x128xf32> to vector<8x128xf32>
    %5 = arith.addf %2, %4 : vector<8x128xf32>
    %cst_5 = arith.constant 0.000000e+00 : f32
    %6 = vector.broadcast %cst_5 : f32 to vector<8x128xf32>
    %7 = arith.maximumf %5, %6 : vector<8x128xf32>
    %c0_6 = arith.constant 0 : index
    %c0_7 = arith.constant 0 : index
    %8 = vector.load %arg4[%c0_6, %c0_7] : memref<128x16xf32, #tpu.memory_space<vmem>>, vector<128x16xf32>
    %cst_8 = arith.constant dense<0.000000e+00> : vector<8x16xf32>
    %9 = tpu.matmul %7, %8, %cst_8 {dimension_numbers = #tpu.dot_dimension_numbers<[1], [0], [0], [1], [0, 0, 1, 1], [], []>} : vector<8x128xf32>, vector<128x16xf32>, vector<8x16xf32> -> vector<8x16xf32>
    %c0_9 = arith.constant 0 : index
    %c0_10 = arith.constant 0 : index
    %10 = vector.load %arg5[%c0_9, %c0_10] : memref<1x16xf32, #tpu.memory_space<vmem>>, vector<1x16xf32>
    %11 = vector.broadcast %10 : vector<1x16xf32> to vector<8x16xf32>
    %12 = arith.addf %9, %11 : vector<8x16xf32>
    %13 = vector.extract_strided_slice %12 {offsets = [0, 0], sizes = [8, 8], strides = [1, 1]} : vector<8x16xf32> to vector<8x8xf32>
    %14 = vector.extract_strided_slice %12 {offsets = [0, 8], sizes = [8, 8], strides = [1, 1]} : vector<8x16xf32> to vector<8x8xf32>
    %cst_11 = arith.constant 5.000000e-01 : f32
    %15 = vector.broadcast %cst_11 : f32 to vector<8x8xf32>
    %16 = arith.mulf %15, %14 : vector<8x8xf32>
    %17 = math.exp %16 : vector<8x8xf32>
    %c0_12 = arith.constant 0 : index
    %c0_13 = arith.constant 0 : index
    %18 = vector.load %arg6[%c0_12, %c0_13] : memref<8x8xf32, #tpu.memory_space<vmem>>, vector<8x8xf32>
    %19 = arith.mulf %17, %18 : vector<8x8xf32>
    %20 = arith.addf %13, %19 : vector<8x8xf32>
    %cst_14 = arith.constant 0.000000e+00 : f32
    %21 = vector.broadcast %cst_14 : f32 to vector<8x104xf32>
    %22 = tpu.concatenate %20, %12, %21 in 1 : vector<8x8xf32>, vector<8x16xf32>, vector<8x104xf32> -> vector<8x128xf32>
    %c0_15 = arith.constant 0 : index
    %c0_16 = arith.constant 0 : index
    %23 = vector.load %arg9[%c0_15, %c0_16] : memref<8x128xf32, #tpu.memory_space<vmem>>, vector<8x128xf32>
    tpu.vector_store %arg9[%c0_15, %c0_16], %22 {strides = array<i32>} : memref<8x128xf32, #tpu.memory_space<vmem>>, vector<8x128xf32>,
    %c0_17 = arith.constant 0 : index
    %c0_18 = arith.constant 0 : index
    %24 = vector.load %arg7[%c0_17, %c0_18] : memref<8x4000xf32, #tpu.memory_space<vmem>>, vector<8x4000xf32>
    %cst_19 = arith.constant dense<0.000000e+00> : vector<8x4000xf32>
    %25 = tpu.matmul %20, %24, %cst_19 {dimension_numbers = #tpu.dot_dimension_numbers<[1], [0], [0], [1], [0, 0, 1, 1], [], []>} : vector<8x8xf32>, vector<8x4000xf32>, vector<8x4000xf32> -> vector<8x4000xf32>
    %c0_20 = arith.constant 0 : index
    %c0_21 = arith.constant 0 : index
    %26 = vector.load %arg8[%c0_20, %c0_21] : memref<8x4000xf32, #tpu.memory_space<vmem>>, vector<8x4000xf32>
    tpu.vector_store %arg8[%c0_20, %c0_21], %25 {strides = array<i32>} : memref<8x4000xf32, #tpu.memory_space<vmem>>, vector<8x4000xf32>,
    return
  }
  func.func @transform_0(%arg0: i32) -> (i32, i32) {
    %c0_i32 = arith.constant 0 : i32
    %c0_i32_0 = arith.constant 0 : i32
    return %arg0, %c0_i32 : i32, i32
  }
  func.func @transform_1(%arg0: i32) -> (i32, i32) {
    %c0_i32 = arith.constant 0 : i32
    %c0_i32_0 = arith.constant 0 : i32
    %c0_i32_1 = arith.constant 0 : i32
    return %c0_i32, %c0_i32_0 : i32, i32
  }
  func.func @transform_2(%arg0: i32) -> (i32, i32) {
    %c0_i32 = arith.constant 0 : i32
    %c0_i32_0 = arith.constant 0 : i32
    %c0_i32_1 = arith.constant 0 : i32
    return %c0_i32, %c0_i32_0 : i32, i32
  }
  func.func @transform_3(%arg0: i32) -> (i32, i32) {
    %c0_i32 = arith.constant 0 : i32
    %c0_i32_0 = arith.constant 0 : i32
    %c0_i32_1 = arith.constant 0 : i32
    return %c0_i32, %c0_i32_0 : i32, i32
  }
  func.func @transform_4(%arg0: i32) -> (i32, i32) {
    %c0_i32 = arith.constant 0 : i32
    %c0_i32_0 = arith.constant 0 : i32
    %c0_i32_1 = arith.constant 0 : i32
    return %c0_i32, %c0_i32_0 : i32, i32
  }
  func.func @transform_5(%arg0: i32) -> (i32, i32) {
    %c0_i32 = arith.constant 0 : i32
    %c0_i32_0 = arith.constant 0 : i32
    return %arg0, %c0_i32 : i32, i32
  }
  func.func @transform_6(%arg0: i32) -> (i32, i32) {
    %c0_i32 = arith.constant 0 : i32
    %c0_i32_0 = arith.constant 0 : i32
    %c0_i32_1 = arith.constant 0 : i32
    return %c0_i32, %c0_i32_0 : i32, i32
  }
  func.func @transform_7(%arg0: i32) -> (i32, i32) {
    %c0_i32 = arith.constant 0 : i32
    %c0_i32_0 = arith.constant 0 : i32
    return %arg0, %c0_i32 : i32, i32
  }
  func.func @transform_8(%arg0: i32) -> (i32, i32) {
    %c0_i32 = arith.constant 0 : i32
    %c0_i32_0 = arith.constant 0 : i32
    return %arg0, %c0_i32 : i32, i32
  }
}

</mosaic_0001>

<bundles_post_ra>
// kernel: vae_forward.1
= control target key start
LH: loop header
LB: loop body
LE: loop exit
PB: predicated region body
PF: predicated region fallthrough
CT: control target
= control target key end

     0   :  { %14 = vsyncpa [#allocation3], 0  ;;  %s2198_s0 = inlined_call_operand.vmem [shape: f32[8,500], index: 0, kind: input, shape index: {}]   ;;  %s2199_s1 = inlined_call_operand.hbm [shape: f32[500,128], index: 1, kind: input, shape index: {}]   ;;  %s2200_s2 = inlined_call_operand.vmem [shape: f32[1,128], index: 2, kind: input, shape index: {}]   ;;  %s2201_s3 = inlined_call_operand.vmem [shape: f32[128,16], index: 3, kind: input, shape index: {}]   ;;  %s2202_s4 = inlined_call_operand.vmem [shape: f32[1,16], index: 4, kind: input, shape index: {}]   ;;  %s2203_s5 = inlined_call_operand.vmem [shape: f32[8,8], index: 5, kind: input, shape index: {}]   ;;  %s2204_s6 = inlined_call_operand.hbm [shape: f32[8,4000], index: 6, kind: input, shape index: {}]   ;;  %s2205_s7 = inlined_call_operand.vmem [shape: f32[8,4000], index: 7, kind: output, shape index: {0}]   ;;  %s2206_s8 = inlined_call_operand.vmem [shape: f32[8,128], index: 8, kind: output, shape index: {1}]  }
   0x1   :  { %15 = vsyncpa [#allocation5], 0  ;;  %s1873_s27 = smov [#allocation2]   ;;  %s1825_s9 = scalar_lea.hbm %s2199_s1, 8064 }
   0x2   :  { %s23_s28 = sshll.u32 %s1873_s27, 4  ;;  %p1826_p0 = scmp.ne.s32.totalorder %s2199_s1, %s1825_s9  ;;  %s24_s28 = int_to_ptr.vmem [resolvable:$true] %s23_s28 }
   0x3   :  { %p1829_p1 = scmp.lt.u32.totalorder %s1825_s9, %s2199_s1 }
   0x5   :  { %p1831_p2 = pnand %p1829_p1, %p1826_p0 }
   0x7   :  { %1834 = shalt.err (!%p1831_p2)
}
   0x8   :  { %s1835_s14 = scalar_lea.vmem %s24_s28, 8064  ;;  %p1840_p4 = scmp.lt.s32.totalorder %s24_s28, %s24_s28 }
   0x9   :  { %p1836_p3 = scmp.ne.s32.totalorder %s24_s28, %s1835_s14  ;;  %p1841_p5 = scmp.lt.s32.totalorder %s1835_s14, %s1835_s14 }
   0xb   :  { %p1842_p6 = por %p1841_p5, %p1840_p4 }
   0xd   :  { %p1843_p7 = pnand %p1842_p6, %p1836_p3 }
   0xf   :  { %1846 = shalt.err (!%p1843_p7)
}
  0x10   :  { %s1874_s15 = smov 128   ;;  %s1875_s16 = smov 8  }
  0x11   :  { %29 = dma.hbm_to_vmem [thread:$0]  %s2199_s1, 8064, %s24_s28, [#allocation3], %s1874_s15, %s1874_s15, %s1875_s16  }
  0x12   :  { %s1876_s19 = smov [#allocation4]   ;;  %s1847_s23 = scalar_lea.hbm %s2204_s6, 4096 }
  0x13   :  { %s44_s20 = sshll.u32 %s1876_s19, 4  ;;  %p1848_p8 = scmp.ne.s32.totalorder %s2204_s6, %s1847_s23  ;;  %s45_s20 = int_to_ptr.vmem [resolvable:$true] %s44_s20 }
  0x14   :  { %p1851_p9 = scmp.lt.u32.totalorder %s1847_s23, %s2204_s6 }
  0x16   :  { %p1853_p10 = pnand %p1851_p9, %p1848_p8 }
  0x18   :  { %1856 = shalt.err (!%p1853_p10)
}
  0x19   :  { %s1857_s29 = scalar_lea.vmem %s45_s20, 4096  ;;  %p1862_p12 = scmp.lt.s32.totalorder %s45_s20, %s45_s20 }
  0x1a   :  { %p1858_p11 = scmp.ne.s32.totalorder %s45_s20, %s1857_s29  ;;  %p1863_p13 = scmp.lt.s32.totalorder %s1857_s29, %s1857_s29 }
  0x1c   :  { %p1864_p0 = por %p1863_p13, %p1862_p12 }
  0x1e   :  { %p1865_p1 = pnand %p1864_p0, %p1858_p11 }
  0x20   :  { %1868 = shalt.err (!%p1865_p1)
}
  0x21   :  { %47 = dma.hbm_to_vmem [thread:$0]  %s2204_s6, 4096, %s45_s20, [#allocation5]  }
  0x22   :  { %1869 = dma.done.wait [#allocation3], 8064  }
  0x23   :  { %1870 = vsyncadd [#allocation3], 4294959232 }
  0x24   :  { %1871 = dma.done.wait [#allocation5], 4096  }
  0x25   :  { %1872 = vsyncadd [#allocation5], 4294963200  ;;  %v1877_v0 = vmov 0.0|0.0   ;;  %v90_v1 = vld [vmem:[#allocation2 + $0x100] sm:$0xff]  ;;  %v91_v2 = vld [vmem:[#allocation2 + $0x108] sm:$0xff]  ;;  %vm128_vm0 = vcmask 949248  }
  0x26   :  { %1746 = vmatprep.subr.bf16.mxu1 %v1877_v0  ;;  %v92_v3 = vld [vmem:[#allocation2 + $0x110] sm:$0xff]  ;;  %v1747_v4 = vpack.c.bf16 %v91_v2, %v90_v1  ;;  %v93_v5 = vld [vmem:[#allocation2 + $0x118] sm:$0xff]  ;;  %v94_v7 = vld [vmem:[#allocation2 + $0x120] sm:$0xff]  ;;  %vm132_vm1 = vcmask 1043456   ;;  %vm1879_vm2 = vmmov 0   ;;  %vm388_vm3 = vcmask 64512  }
  0x27   :  { %v1750_v6 = vpack.c.bf16 %v93_v5, %v92_v3  ;;  %v95_v8 = vld [vmem:[#allocation2 + $0x128] sm:$0xff]  ;;  %v74_v9 = vld [vmem:[#allocation2 + $0x80] sm:$0xff]  ;;  %v76_v15 = vld [vmem:[#allocation2 + $0x90] sm:$0xff]  ;;  %vm390_vm4 = vcmask 195584   ;;  %vm1595_vm5 = vcmask 261120  }
  0x28   :  { %1748 = vmatpush1.bf16.msra.mxu1 %v1747_v4  ;;  %v75_v10 = vld [vmem:[#allocation2 + $0x88] sm:$0xff]  ;;  %v58_v11 = vld [vmem:[#allocation2] sm:$0xff]  ;;  %v77_v16 = vld [vmem:[#allocation2 + $0x98] sm:$0xff]  ;;  %v1753_v18 = vpack.c.bf16 %v95_v8, %v94_v7 }
  0x29   :  { %1749 = vmatprep.subr.bf16.mxu1 %v1877_v0  ;;  %v1714_v12 = vpack.c.bf16 %v75_v10, %v74_v9  ;;  %v59_v13 = vld [vmem:[#allocation2 + $0x8] sm:$0xff]  ;;  %v60_v17 = vld [vmem:[#allocation2 + $0x10] sm:$0xff]  ;;  %v1718_v20 = vpack.c.bf16 %v77_v16, %v76_v15  ;;  %v61_v21 = vld [vmem:[#allocation2 + $0x18] sm:$0xff] }
  0x2a   :  { %v1716_v14 = vpack.c.bf16 %v59_v13, %v58_v11  ;;  %v96_v19 = vld [vmem:[#allocation2 + $0x130] sm:$0xff]  ;;  %v97_v22 = vld [vmem:[#allocation2 + $0x138] sm:$0xff]  ;;  %v1720_v23 = vpack.c.bf16 %v61_v21, %v60_v17  ;;  %v78_v24 = vld [vmem:[#allocation2 + $0xa0] sm:$0xff] }
  0x2b   :  { %1715 = vmatprep.subr.bf16.mxu0 %v1714_v12  ;;  %v79_v25 = vld [vmem:[#allocation2 + $0xa8] sm:$0xff]  ;;  %v62_v27 = vld [vmem:[#allocation2 + $0x20] sm:$0xff]  ;;  %v80_v29 = vld [vmem:[#allocation2 + $0xb0] sm:$0xff]  ;;  %v1756_v31 = vpack.c.bf16 %v97_v22, %v96_v19 }
  0x2c   :  { %1751 = vmatpush1.bf16.msra.mxu1 %v1750_v6  ;;  %1717 = vmatpush3.bf16.msra.mxu0 %v1716_v14  ;;  %v1722_v26 = vpack.c.bf16 %v79_v25, %v78_v24  ;;  %v63_v28 = vld [vmem:[#allocation2 + $0x28] sm:$0xff]  ;;  %v81_v30 = vld [vmem:[#allocation2 + $0xb8] sm:$0xff]  ;;  %v98_v32 = vld [vmem:[#allocation2 + $0x140] sm:$0xff] }
  0x2d   :  { %1752 = vmatprep.subr.bf16.mxu1 %v1877_v0  ;;  %1719 = vmatprep.subr.bf16.mxu0 %v1718_v20  ;;  %v99_v33 = vld [vmem:[#allocation2 + $0x148] sm:$0xff]  ;;  %v1724_v34 = vpack.c.bf16 %v63_v28, %v62_v27  ;;  %v1726_v35 = vpack.c.bf16 %v81_v30, %v80_v29  ;;  %v64_v36 = vld [vmem:[#allocation2 + $0x30] sm:$0xff]  ;;  %v65_v37 = vld [vmem:[#allocation2 + $0x38] sm:$0xff] }
  0x2e   :  { %v82_v38 = vld [vmem:[#allocation2 + $0xc0] sm:$0xff]  ;;  %v83_v39 = vld [vmem:[#allocation2 + $0xc8] sm:$0xff]  ;;  %v1759_v40 = vpack.c.bf16 %v99_v33, %v98_v32  ;;  %v100_v41 = vld [vmem:[#allocation2 + $0x150] sm:$0xff]  ;;  %v1728_v43 = vpack.c.bf16 %v65_v37, %v64_v36 }
  0x2f   :  { %v101_v42 = vld [vmem:[#allocation2 + $0x158] sm:$0xff]  ;;  %v1730_v44 = vpack.c.bf16 %v83_v39, %v82_v38  ;;  %v66_v45 = vld [vmem:[#allocation2 + $0x40] sm:$0xff]  ;;  %v67_v46 = vld [vmem:[#allocation2 + $0x48] sm:$0xff] }
  0x30   :  { %1754 = vmatpush1.bf16.msra.mxu1 %v1753_v18  ;;  %1721 = vmatpush3.bf16.msra.mxu0 %v1720_v23  ;;  %v84_v47 = vld [vmem:[#allocation2 + $0xd0] sm:$0xff]  ;;  %v85_v48 = vld [vmem:[#allocation2 + $0xd8] sm:$0xff]  ;;  %v1762_v49 = vpack.c.bf16 %v101_v42, %v100_v41  ;;  %v102_v50 = vld [vmem:[#allocation2 + $0x160] sm:$0xff]  ;;  %v1732_v52 = vpack.c.bf16 %v67_v46, %v66_v45 }
  0x31   :  { %1755 = vmatprep.subr.bf16.mxu1 %v1877_v0  ;;  %1723 = vmatprep.subr.bf16.mxu0 %v1722_v26  ;;  %v103_v51 = vld [vmem:[#allocation2 + $0x168] sm:$0xff]  ;;  %v1734_v54 = vpack.c.bf16 %v85_v48, %v84_v47  ;;  %v68_v55 = vld [vmem:[#allocation2 + $0x50] sm:$0xff]  ;;  %v69_v56 = vld [vmem:[#allocation2 + $0x58] sm:$0xff] }
  0x32   :  { %v55_v53 = vld [vmem:[%s2198_s0 + $0x8] sm:$0xff]  ;;  %v57_v57 = vld [vmem:[%s2198_s0 + $0x18] sm:$0xff]  ;;  %v86_v58 = vld [vmem:[#allocation2 + $0xe0] sm:$0xff]  ;;  %v1765_v60 = vpack.c.bf16 %v103_v51, %v102_v50  ;;  %v1736_v63 = vpack.c.bf16 %v69_v56, %v68_v55 }
  0x33   :  { %200 = vmatprep.mubr.f32.mxu0 %v55_v53  ;;  %v87_v59 = vld [vmem:[#allocation2 + $0xe8] sm:$0xff]  ;;  %1609 = vmatprep.mubr.msk.f32.mxu1 %vm128_vm0, %v57_v57  ;;  %v104_v61 = vld [vmem:[#allocation2 + $0x170] sm:$0xff]  ;;  %v105_v62 = vld [vmem:[#allocation2 + $0x178] sm:$0xff] }
  0x34   :  { %1757 = vmatpush1.bf16.msra.mxu1 %v1756_v31  ;;  %1725 = vmatpush3.bf16.msra.mxu0 %v1724_v34  ;;  %v1738_v1 = vpack.c.bf16 %v87_v59, %v86_v58  ;;  %v70_v2 = vld [vmem:[#allocation2 + $0x60] sm:$0xff]  ;;  %v71_v3 = vld [vmem:[#allocation2 + $0x68] sm:$0xff]  ;;  %v88_v4 = vld [vmem:[#allocation2 + $0xf0] sm:$0xff]  ;;  %v1768_v6 = vpack.c.bf16 %v105_v62, %v104_v61 }
  0x35   :  { %1758 = vmatprep.subr.bf16.mxu1 %v1877_v0  ;;  %1727 = vmatprep.subr.bf16.mxu0 %v1726_v35  ;;  %v89_v5 = vld [vmem:[#allocation2 + $0xf8] sm:$0xff]  ;;  %v106_v7 = vld [vmem:[#allocation2 + $0x180] sm:$0xff]  ;;  %v107_v8 = vld [vmem:[#allocation2 + $0x188] sm:$0xff]  ;;  %v1740_v9 = vpack.c.bf16 %v71_v3, %v70_v2 }
  0x36   :  { %v1742_v10 = vpack.c.bf16 %v89_v5, %v88_v4  ;;  %v72_v11 = vld [vmem:[#allocation2 + $0x70] sm:$0xff]  ;;  %v73_v12 = vld [vmem:[#allocation2 + $0x78] sm:$0xff]  ;;  %v1771_v13 = vpack.c.bf16 %v107_v8, %v106_v7  ;;  %v277_v17 = vld [vmem:[%s2201_s3] sm:$0xff] }
  0x37   :  { %v108_v14 = vld [vmem:[#allocation2 + $0x190] sm:$0xff]  ;;  %v109_v15 = vld [vmem:[#allocation2 + $0x198] sm:$0xff]  ;;  %v1744_v16 = vpack.c.bf16 %v73_v12, %v72_v11  ;;  %v278_v18 = vld [vmem:[%s2201_s3 + $0x8] sm:$0xff] }
  0x38   :  { %1760 = vmatpush1.bf16.msra.mxu1 %v1759_v40  ;;  %1729 = vmatpush3.bf16.msra.mxu0 %v1728_v43  ;;  %v1774_v19 = vpack.c.bf16 %v109_v15, %v108_v14  ;;  %v110_v20 = vld [vmem:[#allocation2 + $0x1a0] sm:$0xff]  ;;  %v111_v21 = vld [vmem:[#allocation2 + $0x1a8] sm:$0xff]  ;;  %v1792_v23 = vpack.c.bf16 %v278_v18, %v277_v17  ;;  %v279_v24 = vld [vmem:[%s2201_s3 + $0x10] sm:$0xff] }
  0x39   :  { %1761 = vmatprep.subr.bf16.mxu1 %v1877_v0  ;;  %1731 = vmatprep.subr.bf16.mxu0 %v1730_v44  ;;  %v54_v22 = vld [vmem:[%s2198_s0] sm:$0xff]  ;;  %v280_v25 = vld [vmem:[%s2201_s3 + $0x18] sm:$0xff]  ;;  %v1777_v26 = vpack.c.bf16 %v111_v21, %v110_v20  ;;  %v112_v27 = vld [vmem:[#allocation2 + $0x1b0] sm:$0xff] }
  0x3a   :  { %v113_v28 = vld [vmem:[#allocation2 + $0x1b8] sm:$0xff]  ;;  %v1795_v29 = vpack.c.bf16 %v280_v25, %v279_v24  ;;  %v281_v30 = vld [vmem:[%s2201_s3 + $0x20] sm:$0xff]  ;;  %v282_v31 = vld [vmem:[%s2201_s3 + $0x28] sm:$0xff] }
  0x3b   :  { %v1780_v32 = vpack.c.bf16 %v113_v28, %v112_v27  ;;  %v114_v33 = vld [vmem:[#allocation2 + $0x1c0] sm:$0xff]  ;;  %v115_v34 = vld [vmem:[#allocation2 + $0x1c8] sm:$0xff]  ;;  %v1798_v35 = vpack.c.bf16 %v282_v31, %v281_v30  ;;  %v283_v36 = vld [vmem:[%s2201_s3 + $0x30] sm:$0xff] }
  0x3c   :  { %1763 = vmatpush1.bf16.msra.mxu1 %v1762_v49  ;;  %1733 = vmatpush3.bf16.msra.mxu0 %v1732_v52  ;;  %v284_v37 = vld [vmem:[%s2201_s3 + $0x38] sm:$0xff]  ;;  %v1783_v38 = vpack.c.bf16 %v115_v34, %v114_v33  ;;  %v116_v39 = vld [vmem:[#allocation2 + $0x1d0] sm:$0xff]  ;;  %v285_v42 = vld [vmem:[%s2201_s3 + $0x40] sm:$0xff]  ;;  %v1878_v49 = vmov 0.0  }
  0x3d   :  { %1764 = vmatprep.subr.bf16.mxu1 %v1877_v0  ;;  %1735 = vmatprep.subr.bf16.mxu0 %v1734_v54  ;;  %v117_v40 = vld [vmem:[#allocation2 + $0x1d8] sm:$0xff]  ;;  %v1801_v41 = vpack.c.bf16 %v284_v37, %v283_v36  ;;  %v286_v43 = vld [vmem:[%s2201_s3 + $0x48] sm:$0xff]  ;;  %v118_v45 = vld [vmem:[#allocation2 + $0x1e0] sm:$0xff] }
  0x3e   :  { %v1786_v44 = vpack.c.bf16 %v117_v40, %v116_v39  ;;  %v119_v46 = vld [vmem:[#allocation2 + $0x1e8] sm:$0xff]  ;;  %v1804_v47 = vpack.c.bf16 %v286_v43, %v285_v42  ;;  %v120_v50 = vld [vmem:[#allocation2 + $0x1f0] sm:$0xf]  ;;  %v288_v53 = vld [vmem:[%s2201_s3 + $0x58] sm:$0xff] }
  0x3f   :  { %v1789_v48 = vpack.c.bf16 %v119_v46, %v118_v45  ;;  %v56_v51 = vld [vmem:[%s2198_s0 + $0x10] sm:$0xff]  ;;  %v289_v55 = vld [vmem:[%s2201_s3 + $0x60] sm:$0xff]  ;;  %v290_v56 = vld [vmem:[%s2201_s3 + $0x68] sm:$0xff] }
  0x40   :  { %1766 = vmatpush1.bf16.msra.mxu1 %v1765_v60  ;;  %1737 = vmatpush3.bf16.msra.mxu0 %v1736_v63  ;;  %v287_v52 = vld [vmem:[%s2201_s3 + $0x50] sm:$0xff]  ;;  %v1810_v57 = vpack.c.bf16 %v290_v56, %v289_v55  ;;  %v292_v59 = vld [vmem:[%s2201_s3 + $0x78] sm:$0xff]  ;;  %v373_v61 = vld [vmem:[%s2203_s5] sm:$0xff] }
  0x41   :  { %1767 = vmatprep.subr.bf16.mxu1 %v1877_v0  ;;  %1739 = vmatprep.subr.bf16.mxu0 %v1738_v1  ;;  %v1807_v54 = vpack.c.bf16 %v288_v53, %v287_v52  ;;  %v291_v58 = vld [vmem:[%s2201_s3 + $0x70] sm:$0xff]  ;;  %v1607_v1 = vld [vmem:[%s2200_s2] ss:$0 sm:$0xff]  ;;  %s1880_s2 = smov 120   ;;  %v397_v24 = vld [vmem:[#allocation4 + $0x20] sm:$0xff] }
  0x42   :  { %v1813_v60 = vpack.c.bf16 %v292_v59, %v291_v58  ;;  %375 = vrot.lane.b32.xlu0 %v373_v61, %s1875_s16  ;;  %v394_v7 = vld [vmem:[#allocation4 + $0x8] sm:$0xff]  ;;  %v396_v8 = vld [vmem:[#allocation4 + $0x18] sm:$0xff]  ;;  %v399_v25 = vld [vmem:[#allocation4 + $0x30] sm:$0xff] }
  0x43   :  { %v1610_v11 = vld [vmem:[%s2202_s4] ss:$0 sm:$0xff]  ;;  %v400_v18 = vld [vmem:[#allocation4 + $0x38] sm:$0xff]  ;;  %v401_v31 = vld [vmem:[#allocation4 + $0x40] sm:$0xff] }
  0x44   :  { %1769 = vmatpush1.bf16.msra.mxu1 %v1768_v6  ;;  %1741 = vmatpush3.bf16.msra.mxu0 %v1740_v9  ;;  %v393_v9 = vld [vmem:[#allocation4] sm:$0xff]  ;;  %v398_v17 = vld [vmem:[#allocation4 + $0x28] sm:$0xff]  ;;  %v408_v34 = vld [vmem:[#allocation4 + $0x78] sm:$0xff] }
  0x45   :  { %1770 = vmatprep.subr.bf16.mxu1 %v1877_v0  ;;  %1743 = vmatprep.subr.bf16.mxu0 %v1742_v10  ;;  %v395_v10 = vld [vmem:[#allocation4 + $0x10] sm:$0xff]  ;;  %v402_v28 = vld [vmem:[#allocation4 + $0x48] sm:$0xff]  ;;  %v409_v39 = vld [vmem:[#allocation4 + $0x80] sm:$0xff] }
  0x46   :  { %v406_v33 = vld [vmem:[#allocation4 + $0x68] sm:$0xff]  ;;  %v407_v36 = vld [vmem:[#allocation4 + $0x70] sm:$0xff]  ;;  %v416_v42 = vld [vmem:[#allocation4 + $0xb8] sm:$0xff] }
  0x47   :  { %v410_v37 = vld [vmem:[#allocation4 + $0x88] sm:$0xff]  ;;  %v411_v40 = vld [vmem:[#allocation4 + $0x90] sm:$0xff]  ;;  %v413_v43 = vld [vmem:[#allocation4 + $0xa0] sm:$0xff] }
  0x48   :  { %1772 = vmatpush1.bf16.msra.mxu1 %v1771_v13  ;;  %1745 = vmatpush3.bf16.msra.mxu0 %v1744_v16  ;;  %v418_v45 = vld [vmem:[#allocation4 + $0xc8] sm:$0xff]  ;;  %v420_v46 = vld [vmem:[#allocation4 + $0xd8] sm:$0xff]  ;;  %v421_v52 = vld [vmem:[#allocation4 + $0xe0] sm:$0xff] }
  0x49   :  { %1773 = vmatprep.subr.bf16.mxu1 %v1877_v0  ;;  %1791 = vmatprep.subr.bf16.mxu0 %v1877_v0  ;;  %v423_v53 = vld [vmem:[#allocation4 + $0xf0] sm:$0xff] }
  0x4b   :  { %201 = vmatmul.mubr.f32.vlgmr.msra.gmra.mrb[0].mxu0 %v54_v22 }
  0x4c   :  { %1775 = vmatpush1.bf16.msra.mxu1 %v1774_v19  ;;  %1793 = vmatpush3.bf16.msra.mxu0 %v1792_v23 }
  0x4d   :  { %1776 = vmatprep.subr.bf16.mxu1 %v1877_v0  ;;  %1794 = vmatprep.subr.bf16.mxu0 %v1877_v0 }
  0x4e   :  { %1711 = vmatprep.mubr.msk.f32.mxu0 %vm1879_vm2, %v1878_v49 }
  0x50   :  { %1778 = vmatpush1.bf16.msra.mxu1 %v1777_v26  ;;  %1796 = vmatpush3.bf16.msra.mxu0 %v1795_v29  ;;  %v404_v29 = vld [vmem:[#allocation4 + $0x58] sm:$0xff] }
  0x51   :  { %1779 = vmatprep.subr.bf16.mxu1 %v1877_v0  ;;  %1797 = vmatprep.subr.bf16.mxu0 %v1877_v0 }
  0x54   :  { %1781 = vmatpush1.bf16.msra.mxu1 %v1780_v32  ;;  %1799 = vmatpush3.bf16.msra.mxu0 %v1798_v35  ;;  %v403_v32 = vld [vmem:[#allocation4 + $0x50] sm:$0xff]  ;;  %v405_v35 = vld [vmem:[#allocation4 + $0x60] sm:$0xff] }
  0x55   :  { %1782 = vmatprep.subr.bf16.mxu1 %v1877_v0  ;;  %1800 = vmatprep.subr.bf16.mxu0 %v1877_v0 }
  0x58   :  { %1784 = vmatpush1.bf16.msra.mxu1 %v1783_v38  ;;  %1802 = vmatpush3.bf16.msra.mxu0 %v1801_v41  ;;  %v412_v38 = vld [vmem:[#allocation4 + $0x98] sm:$0xff]  ;;  %v414_v41 = vld [vmem:[#allocation4 + $0xa8] sm:$0xff] }
  0x59   :  { %1785 = vmatprep.subr.bf16.mxu1 %v1877_v0  ;;  %1803 = vmatprep.subr.bf16.mxu0 %v1877_v0 }
  0x5c   :  { %1787 = vmatpush1.bf16.msra.mxu1 %v1786_v44  ;;  %1805 = vmatpush3.bf16.msra.mxu0 %v1804_v47  ;;  %v415_v44 = vld [vmem:[#allocation4 + $0xb0] sm:$0xff]  ;;  %v417_v47 = vld [vmem:[#allocation4 + $0xc0] sm:$0xff] }
  0x5d   :  { %1788 = vmatprep.subr.bf16.mxu1 %v1877_v0  ;;  %1806 = vmatprep.subr.bf16.mxu0 %v1877_v0 }
  0x60   :  { %1790 = vmatpush1.bf16.msra.mxu1 %v1789_v48  ;;  %1808 = vmatpush3.bf16.msra.mxu0 %v1807_v54  ;;  %v419_v48 = vld [vmem:[#allocation4 + $0xd0] sm:$0xff] }
  0x61   :  { %266 = vmatprep.subr.mxu1 %v1878_v49  ;;  %1809 = vmatprep.subr.bf16.mxu0 %v1877_v0 }
  0x64   :  { %1608 = vmatpush1.msk.msra.mxu1 %vm132_vm1, %v120_v50  ;;  %1811 = vmatpush3.bf16.msra.mxu0 %v1810_v57  ;;  %v422_v50 = vld [vmem:[#allocation4 + $0xe8] sm:$0xff] }
  0x65   :  { %271 = vmatmul.mubr.f32.vlgmr.msra.gmra.mrb[0].mxu1 %v56_v51  ;;  %1812 = vmatprep.subr.bf16.mxu0 %v1877_v0  ;;  %v424_v51 = vld [vmem:[#allocation4 + $0xf8] sm:$0xff] }
  0x66   :  { %492 = vmatprep.mubr.f32.mxu1 %v1878_v49  ;;  %428 = vmatprep.subr.mxu1 %v394_v7 }
  0x67   :  { %429 = vmatpush1.msra.mxu1 %v393_v9 }
  0x68   :  { %1814 = vmatpush3.bf16.msra.mxu0 %v1813_v60  ;;  %570 = vmatprep.subr.mxu1 %v398_v17 }
  0x69   :  { %499 = vmatprep.subr.mxu0 %v396_v8 }
  0xb4   :  { %v376_v19 = vpop.permute.xlu0 %375 }
 0x11e   :  { %v1659_v0 = vpop.f32.mrb[0].mxu0 }
 0x11f   :  { %v1660_v62 = vpop.f32.mrb[1].mxu0 }
 0x120   :  { %v1661_v63 = vadd.f32 %v1660_v62, %v1659_v0 }
 0x122   :  { %v203_v2 = vadd.f32 %v1661_v63, %v1607_v1 }
 0x138   :  { %v272_v3 = vpop.f32.mrb[0].mxu1 }
 0x139   :  { %v273_v4 = vadd.f32 %v272_v3, %v203_v2  ;;  %v274_v5 = vpop.f32.mrb[1].mxu1 }
 0x13b   :  { %v276_v6 = vmax.f32 %v273_v4, 0.0 }
 0x13d   :  { %1712 = vmatmul.mubr.f32.vlgmr.msra.gmra.mrb[2].mxu0 %v276_v6 }
 0x13e   :  { %563 = vmatprep.mubr.f32.mxu0 %v1878_v49  ;;  %500 = vmatpush1.msra.mxu0 %v395_v10 }
 0x13f   :  { %641 = vmatprep.subr.mxu0 %v400_v18 }
 0x210   :  { %v366_v12 = vpop.f32.mrb[2].mxu0 }
 0x211   :  { %v367_v13 = vadd.f32 %v1610_v11, %v366_v12  ;;  %v1713_v14 = vpop.f32.mrb[3].mxu0 }
 0x213   :  { %v370_v15 = vmul.f32 0.5, %v367_v13  ;;  %385 = vrot.lane.b32.xlu1 %v367_v13, %s1875_s16 }
 0x215   :  { %v371_v16 = vmul.f32 1.442695, %v370_v15 }
 0x217   :  { %1823 = vpow2.f32 %v371_v16 }
 0x221   :  { %v1824_v20 = vpop.eup %1823 }
 0x222   :  { %v378_v21 = vmul.f32 %v1824_v20, %v376_v19 }
 0x224   :  { %380 = vrot.lane.b32.xlu0 %v378_v21, %s1880_s2 }
 0x285   :  { %v386_v26 = vpop.permute.xlu1 %385 }
 0x296   :  { %v381_v22 = vpop.permute.xlu0 %380 }
 0x297   :  { %v2049_v23 = vadd.f32 %v381_v22, %v367_v13 }
 0x299   :  { %v389_v27 = vsel %vm388_vm3, %v2049_v23, %v386_v26  ;;  %1611 = vmatmul.mubr.msk.f32.vlgmr.msra.gmra.mrb[2].mxu1 %vm388_vm3, %v2049_v23  ;;  %1612 = vmatmul.mubr.msk.f32.vlgmr.msra.gmra.mrb[4].mxu0 %vm388_vm3, %v2049_v23 }
 0x29a   :  { %v391_v30 = vsel %vm390_vm4, %v389_v27, 0.0  ;;  %571 = vmatpush1.msra.mxu1 %v397_v24  ;;  %642 = vmatpush1.msra.mxu0 %v399_v25 }
 0x29b   :  { %392 = vst [vmem:[%s2206_s8] sm:$0xff] %v391_v30  ;;  %634 = vmatprep.mubr.f32.mxu1 %v1878_v49  ;;  %705 = vmatprep.mubr.f32.mxu0 %v1878_v49 }
 0x29c   :  { %712 = vmatprep.subr.mxu1 %v402_v28  ;;  %783 = vmatprep.subr.mxu0 %v404_v29 }
 0x29d   :  { %1613 = vmatmul.mubr.msk.f32.vlgmr.msra.gmra.mrb[4].mxu1 %vm388_vm3, %v2049_v23  ;;  %1614 = vmatmul.mubr.msk.f32.vlgmr.msra.gmra.mrb[6].mxu0 %vm388_vm3, %v2049_v23 }
 0x29e   :  { %713 = vmatpush1.msra.mxu1 %v401_v31  ;;  %784 = vmatpush1.msra.mxu0 %v403_v32 }
 0x29f   :  { %776 = vmatprep.mubr.f32.mxu1 %v1878_v49  ;;  %847 = vmatprep.mubr.f32.mxu0 %v1878_v49 }
 0x2a0   :  { %854 = vmatprep.subr.mxu1 %v406_v33  ;;  %925 = vmatprep.subr.mxu0 %v408_v34 }
 0x2a1   :  { %1615 = vmatmul.mubr.msk.f32.vlgmr.msra.gmra.mrb[6].mxu1 %vm388_vm3, %v2049_v23  ;;  %1616 = vmatmul.mubr.msk.f32.vlgmr.msra.gmra.mrb[8].mxu0 %vm388_vm3, %v2049_v23 }
 0x2a2   :  { %855 = vmatpush1.msra.mxu1 %v405_v35  ;;  %926 = vmatpush1.msra.mxu0 %v407_v36 }
 0x2a3   :  { %918 = vmatprep.mubr.f32.mxu1 %v1878_v49  ;;  %989 = vmatprep.mubr.f32.mxu0 %v1878_v49 }
 0x2a4   :  { %996 = vmatprep.subr.mxu1 %v410_v37  ;;  %1067 = vmatprep.subr.mxu0 %v412_v38 }
 0x2a5   :  { %1617 = vmatmul.mubr.msk.f32.vlgmr.msra.gmra.mrb[8].mxu1 %vm388_vm3, %v2049_v23  ;;  %1618 = vmatmul.mubr.msk.f32.vlgmr.msra.gmra.mrb[10].mxu0 %vm388_vm3, %v2049_v23 }
 0x2a6   :  { %997 = vmatpush1.msra.mxu1 %v409_v39  ;;  %1068 = vmatpush1.msra.mxu0 %v411_v40 }
 0x2a7   :  { %1060 = vmatprep.mubr.f32.mxu1 %v1878_v49  ;;  %1131 = vmatprep.mubr.f32.mxu0 %v1878_v49 }
 0x2a8   :  { %1138 = vmatprep.subr.mxu1 %v414_v41  ;;  %1209 = vmatprep.subr.mxu0 %v416_v42 }
 0x2a9   :  { %1619 = vmatmul.mubr.msk.f32.vlgmr.msra.gmra.mrb[10].mxu1 %vm388_vm3, %v2049_v23  ;;  %1620 = vmatmul.mubr.msk.f32.vlgmr.msra.gmra.mrb[12].mxu0 %vm388_vm3, %v2049_v23 }
 0x2aa   :  { %1139 = vmatpush1.msra.mxu1 %v413_v43  ;;  %1210 = vmatpush1.msra.mxu0 %v415_v44 }
 0x2ab   :  { %1202 = vmatprep.mubr.f32.mxu1 %v1878_v49  ;;  %1273 = vmatprep.mubr.f32.mxu0 %v1878_v49 }
 0x2ac   :  { %1280 = vmatprep.subr.mxu1 %v418_v45  ;;  %1351 = vmatprep.subr.mxu0 %v420_v46 }
 0x2ad   :  { %1621 = vmatmul.mubr.msk.f32.vlgmr.msra.gmra.mrb[12].mxu1 %vm388_vm3, %v2049_v23  ;;  %1622 = vmatmul.mubr.msk.f32.vlgmr.msra.gmra.mrb[14].mxu0 %vm388_vm3, %v2049_v23 }
 0x2ae   :  { %1281 = vmatpush1.msra.mxu1 %v417_v47  ;;  %1352 = vmatpush1.msra.mxu0 %v419_v48 }
 0x2af   :  { %1344 = vmatprep.mubr.f32.mxu1 %v1878_v49  ;;  %1415 = vmatprep.mubr.f32.mxu0 %v1878_v49 }
 0x2b0   :  { %1422 = vmatprep.subr.mxu1 %v422_v50  ;;  %1493 = vmatprep.subr.mxu0 %v424_v51 }
 0x2b1   :  { %1623 = vmatmul.mubr.msk.f32.vlgmr.msra.gmra.mrb[14].mxu1 %vm388_vm3, %v2049_v23  ;;  %1624 = vmatmul.mubr.msk.f32.vlgmr.msra.gmra.mrb[16].mxu0 %vm388_vm3, %v2049_v23 }
 0x2b2   :  { %1423 = vmatpush1.msra.mxu1 %v421_v52  ;;  %1494 = vmatpush1.msra.mxu0 %v423_v53 }
 0x2b3   :  { %1486 = vmatprep.mubr.f32.mxu1 %v1878_v49  ;;  %1557 = vmatprep.mubr.f32.mxu0 %v1878_v49 }
 0x2b5   :  { %1625 = vmatmul.mubr.msk.f32.vlgmr.msra.gmra.mrb[16].mxu1 %vm388_vm3, %v2049_v23  ;;  %1626 = vmatmul.mubr.msk.f32.vlgmr.msra.gmra.mrb[18].mxu0 %vm388_vm3, %v2049_v23 }
 0x36c   :  { %v494_v54 = vpop.f32.mrb[2].mxu1  ;;  %v565_v55 = vpop.f32.mrb[4].mxu0 }
 0x36d   :  { %1564 = vst [vmem:[%s2205_s7] sm:$0xff] %v494_v54  ;;  %1566 = vst [vmem:[%s2205_s7 + $0x10] sm:$0xff] %v565_v55  ;;  %v496_v56 = vpop.f32.mrb[3].mxu1  ;;  %v567_v57 = vpop.f32.mrb[5].mxu0 }
 0x36e   :  { %1565 = vst [vmem:[%s2205_s7 + $0x8] sm:$0xff] %v496_v56  ;;  %1567 = vst [vmem:[%s2205_s7 + $0x18] sm:$0xff] %v567_v57 }
 0x370   :  { %v636_v49 = vpop.f32.mrb[4].mxu1  ;;  %v707_v58 = vpop.f32.mrb[6].mxu0 }
 0x371   :  { %1568 = vst [vmem:[%s2205_s7 + $0x20] sm:$0xff] %v636_v49  ;;  %1570 = vst [vmem:[%s2205_s7 + $0x30] sm:$0xff] %v707_v58  ;;  %v638_v59 = vpop.f32.mrb[5].mxu1  ;;  %v709_v60 = vpop.f32.mrb[7].mxu0 }
 0x372   :  { %1569 = vst [vmem:[%s2205_s7 + $0x28] sm:$0xff] %v638_v59  ;;  %1571 = vst [vmem:[%s2205_s7 + $0x38] sm:$0xff] %v709_v60 }
 0x374   :  { %v778_v61 = vpop.f32.mrb[6].mxu1  ;;  %v849_v0 = vpop.f32.mrb[8].mxu0 }
 0x375   :  { %1572 = vst [vmem:[%s2205_s7 + $0x40] sm:$0xff] %v778_v61  ;;  %1574 = vst [vmem:[%s2205_s7 + $0x50] sm:$0xff] %v849_v0  ;;  %v780_v62 = vpop.f32.mrb[7].mxu1  ;;  %v851_v63 = vpop.f32.mrb[9].mxu0 }
 0x376   :  { %1573 = vst [vmem:[%s2205_s7 + $0x48] sm:$0xff] %v780_v62  ;;  %1575 = vst [vmem:[%s2205_s7 + $0x58] sm:$0xff] %v851_v63 }
 0x378   :  { %v920_v1 = vpop.f32.mrb[8].mxu1  ;;  %v991_v2 = vpop.f32.mrb[10].mxu0 }
 0x379   :  { %1576 = vst [vmem:[%s2205_s7 + $0x60] sm:$0xff] %v920_v1  ;;  %1578 = vst [vmem:[%s2205_s7 + $0x70] sm:$0xff] %v991_v2  ;;  %v922_v3 = vpop.f32.mrb[9].mxu1  ;;  %v993_v4 = vpop.f32.mrb[11].mxu0 }
 0x37a   :  { %1577 = vst [vmem:[%s2205_s7 + $0x68] sm:$0xff] %v922_v3  ;;  %1579 = vst [vmem:[%s2205_s7 + $0x78] sm:$0xff] %v993_v4 }
 0x37c   :  { %v1062_v5 = vpop.f32.mrb[10].mxu1  ;;  %v1133_v6 = vpop.f32.mrb[12].mxu0 }
 0x37d   :  { %1580 = vst [vmem:[%s2205_s7 + $0x80] sm:$0xff] %v1062_v5  ;;  %1582 = vst [vmem:[%s2205_s7 + $0x90] sm:$0xff] %v1133_v6  ;;  %v1064_v7 = vpop.f32.mrb[11].mxu1  ;;  %v1135_v8 = vpop.f32.mrb[13].mxu0 }
 0x37e   :  { %1581 = vst [vmem:[%s2205_s7 + $0x88] sm:$0xff] %v1064_v7  ;;  %1583 = vst [vmem:[%s2205_s7 + $0x98] sm:$0xff] %v1135_v8 }
 0x380   :  { %v1204_v9 = vpop.f32.mrb[12].mxu1  ;;  %v1275_v10 = vpop.f32.mrb[14].mxu0 }
 0x381   :  { %1584 = vst [vmem:[%s2205_s7 + $0xa0] sm:$0xff] %v1204_v9  ;;  %1586 = vst [vmem:[%s2205_s7 + $0xb0] sm:$0xff] %v1275_v10  ;;  %v1206_v11 = vpop.f32.mrb[13].mxu1  ;;  %v1277_v12 = vpop.f32.mrb[15].mxu0 }
 0x382   :  { %1585 = vst [vmem:[%s2205_s7 + $0xa8] sm:$0xff] %v1206_v11  ;;  %1587 = vst [vmem:[%s2205_s7 + $0xb8] sm:$0xff] %v1277_v12 }
 0x384   :  { %v1346_v13 = vpop.f32.mrb[14].mxu1  ;;  %v1417_v14 = vpop.f32.mrb[16].mxu0 }
 0x385   :  { %1588 = vst [vmem:[%s2205_s7 + $0xc0] sm:$0xff] %v1346_v13  ;;  %1590 = vst [vmem:[%s2205_s7 + $0xd0] sm:$0xff] %v1417_v14  ;;  %v1348_v15 = vpop.f32.mrb[15].mxu1  ;;  %v1419_v16 = vpop.f32.mrb[17].mxu0 }
 0x386   :  { %1589 = vst [vmem:[%s2205_s7 + $0xc8] sm:$0xff] %v1348_v15  ;;  %1591 = vst [vmem:[%s2205_s7 + $0xd8] sm:$0xff] %v1419_v16 }
 0x388   :  { %v1488_v17 = vpop.f32.mrb[16].mxu1  ;;  %v1559_v18 = vpop.f32.mrb[18].mxu0 }
 0x389   :  { %1592 = vst [vmem:[%s2205_s7 + $0xe0] sm:$0xff] %v1488_v17  ;;  %1594 = vst [vmem:[%s2205_s7 + $0xf0] sm:$0xff] %v1559_v18  ;;  %v1490_v19 = vpop.f32.mrb[17].mxu1  ;;  %v1561_v20 = vpop.f32.mrb[19].mxu0 }
 0x38a   :  { %1593 = vst [vmem:[%s2205_s7 + $0xe8] sm:$0xff] %v1490_v19  ;;  %1596 = vst.msk [vmem:[%s2205_s7 + $0xf8] sm:$0xff] %vm1595_vm5, %v1561_v20 }
 0x38b   :  { %1605 = vsyncpa [#allocation3], 1 }
 0x38c   :  { %1606 = vsyncpa [#allocation5], 1 }

</bundles_post_ra>
